<compile_context>
chip_gen: v7x
topology: tpu7x:2x2x1
jax: 0.10.0
libtpu: 0.0.40
codegen_flags: <defaults>
</compile_context>

<pallas_src>
import functools
import math

import jax
import jax.numpy as jnp
from jax import lax
from jax.experimental import pallas as pl
from jax.experimental.pallas import tpu as pltpu

_INV_SQRT2 = 1.0 / math.sqrt(2.0)
_LANE = 128
_SUBLANE_BF16 = 16


def _round_up(x, m):
    return (x + m - 1) // m * m


def _generator_kernel(layer_dims, x_ref, *refs):
    """Fused generator MLP with streamed, double-buffered weights.

    refs layout (after x_ref):
      w_hbm_0 .. w_hbm_{L-1} : bf16 (din_pad, dout_pad), left in HBM (pl.ANY)
      gb_ref                 : f32 (L, 2, Dmax); [l,0]=gamma, [l,1]=beta
      o_ref                  : f32 (B, Dout_last_pad)
      wbuf                   : bf16 (2, max_din, max_dout) VMEM double buffer
      sem                    : DMA semaphores, shape (2,)
    """
    L = len(layer_dims)
    w_hbm = refs[:L]
    gb_ref = refs[L]
    o_ref = refs[L + 1]
    wbuf = refs[L + 2]
    sem = refs[L + 3]

    # One DMA descriptor per layer (trace-time unrolled, reused for start/wait).
    copies = []
    for l, (din, dout) in enumerate(layer_dims):
        slot = l & 1
        copies.append(
            pltpu.make_async_copy(w_hbm[l], wbuf.at[slot, :din, :dout],
                                  sem.at[slot]))

    copies[0].start()                                   # prime slot 0

    h = x_ref[...]                                      # (B, Din0) f32
    for l, (din, dout) in enumerate(layer_dims):
        slot = l & 1
        copies[l].wait()
        if l + 1 < L:
            copies[l + 1].start()                       # overlap next weight DMA

        # Linear on the MXU: bf16 operands, f32 accumulation.  Linear bias is
        # omitted -- cancelled exactly by the train-mode BN mean subtraction.
        w = wbuf[slot, :din, :dout]                     # bf16 (din, dout)
        y = jnp.dot(h.astype(jnp.bfloat16), w,
                    preferred_element_type=jnp.float32)  # (B, dout) f32

        # BatchNorm1d (training): batch mean, biased variance, eps=1e-5,
        # affine folded into a single per-feature scale/shift.
        mean = jnp.mean(y, axis=0, keepdims=True)        # (1, dout)
        diff = y - mean
        var = jnp.mean(diff * diff, axis=0, keepdims=True)
        gamma = gb_ref[l, 0:1, :dout]                    # (1, dout)
        beta = gb_ref[l, 1:2, :dout]
        scale = gamma * lax.rsqrt(var + 1e-5)
        shift = beta - mean * scale
        z = y * scale + shift

        # Exact (erf) GELU -- matches PyTorch's default nn.GELU().
        h = 0.5 * z * (1.0 + lax.erf(z * _INV_SQRT2))

    o_ref[...] = h                                       # lane-dense store


def _fused_generator(x, ws_bf16, gb, layer_dims):
    """Single pallas_call running the whole generator MLP."""
    B = x.shape[0]
    L = len(ws_bf16)
    max_din = max(d for d, _ in layer_dims)
    max_dout = max(d for _, d in layer_dims)
    out_pad = layer_dims[-1][1]

    vmem = pl.BlockSpec(memory_space=pltpu.MemorySpace.VMEM)
    hbm = pl.BlockSpec(memory_space=pl.ANY)

    # Explicit scoped-VMEM budget: resident activations/params + double-buffered
    # weight scratch + headroom (v5e's 16 MiB default is the first limit hit on
    # the scaling path; keep it explicit even though the toy shapes are tiny).
    resident = (x.size * 4 + gb.size * 4 + B * out_pad * 4
                + 2 * max_din * max_dout * 2 + 6 * B * max_dout * 4)
    vmem_limit = int(min(64 << 20, max(16 << 20, 2 * resident)))

    flops = 2 * B * sum(din * dout for din, dout in layer_dims)
    transcendentals = B * sum(dout for _, dout in layer_dims)
    bytes_accessed = (x.size * 4 + gb.size * 4 + B * out_pad * 4
                      + sum(int(w.size) * 2 for w in ws_bf16))

    kernel = functools.partial(_generator_kernel, tuple(layer_dims))
    return pl.pallas_call(
        kernel,
        out_shape=jax.ShapeDtypeStruct((B, out_pad), jnp.float32),
        in_specs=[vmem] + [hbm] * L + [vmem],
        out_specs=vmem,
        scratch_shapes=[
            pltpu.VMEM((2, max_din, max_dout), jnp.bfloat16),
            pltpu.SemaphoreType.DMA((2,)),
        ],
        compiler_params=pltpu.CompilerParams(vmem_limit_bytes=vmem_limit),
        cost_estimate=pl.CostEstimate(flops=flops,
                                      transcendentals=transcendentals,
                                      bytes_accessed=bytes_accessed),
    )(x, *ws_bf16, gb)


def _prepare_kernel_inputs(x, params):
    """Zero-pad feature dims to lane multiples, pre-cast weights to bf16, pack
    gamma/beta into one (L, 2, Dmax) slab.  Padding is exact: padded weight
    columns/rows are zero, gamma_pad=1, beta_pad=0 => padded features stay 0."""
    latent_dim = x.shape[1]
    dout_pads = [_round_up(w.shape[1], _LANE) for (w, _b, _g, _bt) in params]
    din_pads = [_round_up(latent_dim, _SUBLANE_BF16)] + dout_pads[:-1]
    dmax = max(dout_pads)

    if din_pads[0] != latent_dim:
        xp = jnp.zeros((x.shape[0], din_pads[0]), jnp.float32)
        x = xp.at[:, :latent_dim].set(x)

    ws, gbs, layer_dims = [], [], []
    for l, (w, _b, g, bt) in enumerate(params):
        din, dout = w.shape
        dinp, doutp = din_pads[l], dout_pads[l]
        wp = jnp.zeros((dinp, doutp), jnp.float32).at[:din, :dout].set(w)
        ws.append(wp.astype(jnp.bfloat16))
        gp = jnp.ones((dmax,), jnp.float32).at[:dout].set(g)
        bp = jnp.zeros((dmax,), jnp.float32).at[:dout].set(bt)
        gbs.append(jnp.stack([gp, bp], axis=0))
        layer_dims.append((dinp, doutp))
    gb = jnp.stack(gbs, axis=0)                          # (L, 2, Dmax)
    return x, ws, gb, layer_dims


def init_generator_params(key, n_layers, n_neurons, latent_dim, output_dim):
    """Deterministic parameter init matching the shapes in mlp(...)."""
    params = []
    in_dim = latent_dim
    for i in range(n_layers):
        out_dim = output_dim if i > n_layers - 2 else n_neurons
        key, kw, kb = jax.random.split(key, 3)
        bound = 1.0 / math.sqrt(in_dim)
        w = jax.random.uniform(kw, (in_dim, out_dim), jnp.float32, -bound, bound)
        b = jax.random.uniform(kb, (out_dim,), jnp.float32, -bound, bound)
        gamma = jnp.ones((out_dim,), jnp.float32)   # BatchNorm1d weight
        beta = jnp.zeros((out_dim,), jnp.float32)   # BatchNorm1d bias
        params.append((w, b, gamma, beta))
        in_dim = out_dim
    return params


@jax.jit
def generator_forward(x, params):
    """Sequential(mlp(n_layers, n_neurons, latent_dim, output_dim)) forward."""
    output_dim = params[-1][0].shape[1]
    x_pad, ws, gb, layer_dims = _prepare_kernel_inputs(x, params)
    out = _fused_generator(x_pad, ws, gb, layer_dims)
    return out[:, :output_dim]                           # drop lane padding


def _reference_forward(x, params):
    """Pure-JAX f32 reference with exact module semantics (incl. Linear bias)."""
    h = x
    for (w, b, g, bt) in params:
        y = h @ w + b
        mean = jnp.mean(y, axis=0, keepdims=True)
        var = jnp.mean((y - mean) ** 2, axis=0, keepdims=True)
        z = g * (y - mean) * lax.rsqrt(var + 1e-5) + bt
        h = 0.5 * z * (1.0 + lax.erf(z * _INV_SQRT2))
    return h


if __name__ == "__main__":
    # Small hparams consistent with the module (generator MLP on latent vectors).
    n_layers = 3
    n_neurons = 32
    latent_dim = 32
    output_dim = 16
    batch = 16   # multiple of 16 (bf16 sublane tile); batch is never padded.

    key = jax.random.PRNGKey(0)
    key, kx = jax.random.split(key)
    x = jax.random.normal(kx, (batch, latent_dim), jnp.float32)
    params = init_generator_params(key, n_layers, n_neurons, latent_dim,
                                   output_dim)

    out = jax.block_until_ready(generator_forward(x, params))
    assert out.shape == (batch, output_dim), out.shape
    assert bool(jnp.all(jnp.isfinite(out)))

    # Tolerance-level check vs the f32 reference; the gap is dominated by the
    # intentional bf16 MXU cast (documented precision tradeoff).
    ref = _reference_forward(x, params)
    err = float(jnp.max(jnp.abs(out - ref)))
    assert err < 2e-1, f"max abs error vs f32 reference: {err}"

    print("KERNEL_OK")
</pallas_src>

<mosaic_0001>
module attributes {stable_mosaic.version = 11 : i64} {
  func.func @_generator_kernel(%arg0: memref<16x32xf32, #tpu.memory_space<vmem>>, %arg1: memref<32x128xbf16, #tpu.memory_space<any>>, %arg2: memref<128x128xbf16, #tpu.memory_space<any>>, %arg3: memref<128x128xbf16, #tpu.memory_space<any>>, %arg4: memref<3x2x128xf32, #tpu.memory_space<vmem>>, %arg5: memref<16x128xf32, #tpu.memory_space<vmem>>, %arg6: memref<2x128x128xbf16, #tpu.memory_space<vmem>>, %arg7: memref<2x!tpu.dma_semaphore, #tpu.memory_space<semaphore_mem>>) attributes {dimension_semantics = [], scalar_prefetch = 0 : i64, scratch_operands = 2 : i64, tpu.core_type = #tpu.core_type<tc>} {
    %c0_i32 = arith.constant 0 : i32
    %c0_i32_0 = arith.constant 0 : i32
    %c0_i32_1 = arith.constant 0 : i32
    %c0_i32_2 = arith.constant 0 : i32
    %0 = tpu.memref_slice %arg6[%c0_i32, %c0_i32_1, %c0_i32_2] : memref<2x128x128xbf16, #tpu.memory_space<vmem>> -> memref<1x32x128xbf16, #tpu.memory_space<vmem>>
    %1 = tpu.memref_squeeze %0 : memref<1x32x128xbf16, #tpu.memory_space<vmem>> -> memref<32x128xbf16, #tpu.memory_space<vmem>>
    %2 = tpu.memref_slice %arg7[%c0_i32_0] : memref<2x!tpu.dma_semaphore, #tpu.memory_space<semaphore_mem>> -> memref<1x!tpu.dma_semaphore, #tpu.memory_space<semaphore_mem>>
    %3 = tpu.memref_squeeze %2 : memref<1x!tpu.dma_semaphore, #tpu.memory_space<semaphore_mem>> -> memref<!tpu.dma_semaphore, #tpu.memory_space<semaphore_mem>>
    tpu.enqueue_dma source(%arg1 : memref<32x128xbf16, #tpu.memory_space<any>>) target(%1 : memref<32x128xbf16, #tpu.memory_space<vmem>>) target_semaphore(%3 : memref<!tpu.dma_semaphore, #tpu.memory_space<semaphore_mem>>)
    %c0 = arith.constant 0 : index
    %c0_3 = arith.constant 0 : index
    %4 = vector.load %arg0[%c0, %c0_3] : memref<16x32xf32, #tpu.memory_space<vmem>>, vector<16x32xf32>
    %c0_i32_4 = arith.constant 0 : i32
    %c0_i32_5 = arith.constant 0 : i32
    %c0_i32_6 = arith.constant 0 : i32
    %c0_i32_7 = arith.constant 0 : i32
    %5 = tpu.memref_slice %arg6[%c0_i32_4, %c0_i32_6, %c0_i32_7] : memref<2x128x128xbf16, #tpu.memory_space<vmem>> -> memref<1x32x128xbf16, #tpu.memory_space<vmem>>
    %6 = tpu.memref_squeeze %5 : memref<1x32x128xbf16, #tpu.memory_space<vmem>> -> memref<32x128xbf16, #tpu.memory_space<vmem>>
    %7 = tpu.memref_slice %arg7[%c0_i32_5] : memref<2x!tpu.dma_semaphore, #tpu.memory_space<semaphore_mem>> -> memref<1x!tpu.dma_semaphore, #tpu.memory_space<semaphore_mem>>
    %8 = tpu.memref_squeeze %7 : memref<1x!tpu.dma_semaphore, #tpu.memory_space<semaphore_mem>> -> memref<!tpu.dma_semaphore, #tpu.memory_space<semaphore_mem>>
    tpu.wait_dma2 semaphore(%8 : memref<!tpu.dma_semaphore, #tpu.memory_space<semaphore_mem>>) src(%arg1 : memref<32x128xbf16, #tpu.memory_space<any>>) dst(%6 : memref<32x128xbf16, #tpu.memory_space<vmem>>)
    %c1_i32 = arith.constant 1 : i32
    %c1_i32_8 = arith.constant 1 : i32
    %c0_i32_9 = arith.constant 0 : i32
    %c0_i32_10 = arith.constant 0 : i32
    %9 = tpu.memref_slice %arg6[%c1_i32, %c0_i32_9, %c0_i32_10] : memref<2x128x128xbf16, #tpu.memory_space<vmem>> -> memref<1x128x128xbf16, #tpu.memory_space<vmem>>
    %10 = tpu.memref_squeeze %9 : memref<1x128x128xbf16, #tpu.memory_space<vmem>> -> memref<128x128xbf16, #tpu.memory_space<vmem>>
    %11 = tpu.memref_slice %arg7[%c1_i32_8] : memref<2x!tpu.dma_semaphore, #tpu.memory_space<semaphore_mem>> -> memref<1x!tpu.dma_semaphore, #tpu.memory_space<semaphore_mem>>
    %12 = tpu.memref_squeeze %11 : memref<1x!tpu.dma_semaphore, #tpu.memory_space<semaphore_mem>> -> memref<!tpu.dma_semaphore, #tpu.memory_space<semaphore_mem>>
    tpu.enqueue_dma source(%arg2 : memref<128x128xbf16, #tpu.memory_space<any>>) target(%10 : memref<128x128xbf16, #tpu.memory_space<vmem>>) target_semaphore(%12 : memref<!tpu.dma_semaphore, #tpu.memory_space<semaphore_mem>>)
    %c0_11 = arith.constant 0 : index
    %c0_12 = arith.constant 0 : index
    %c0_13 = arith.constant 0 : index
    %13 = vector.load %arg6[%c0_11, %c0_12, %c0_13] : memref<2x128x128xbf16, #tpu.memory_space<vmem>>, vector<1x32x128xbf16>
    %14 = vector.shape_cast %13 : vector<1x32x128xbf16> to vector<32x128xbf16>
    %15 = arith.truncf %4 : vector<16x32xf32> to vector<16x32xbf16>
    %cst = arith.constant dense<0.000000e+00> : vector<16x128xf32>
    %16 = tpu.matmul %15, %14, %cst {dimension_numbers = #tpu.dot_dimension_numbers<[1], [0], [0], [1], [0, 0, 1, 1], [], []>} : vector<16x32xbf16>, vector<32x128xbf16>, vector<16x128xf32> -> vector<16x128xf32>
    %cst_14 = arith.constant dense<0.000000e+00> : vector<128xf32>
    %17 = vector.multi_reduction <add>, %16, %cst_14 [0] : vector<16x128xf32> to vector<128xf32>
    %18 = vector.shape_cast %17 : vector<128xf32> to vector<1x128xf32>
    %cst_15 = arith.constant 1.600000e+01 : f32
    %19 = vector.broadcast %cst_15 : f32 to vector<1x128xf32>
    %20 = arith.divf %18, %19 : vector<1x128xf32>
    %21 = vector.broadcast %20 : vector<1x128xf32> to vector<16x128xf32>
    %22 = arith.subf %16, %21 : vector<16x128xf32>
    %23 = arith.mulf %22, %22 : vector<16x128xf32>
    %cst_16 = arith.constant dense<0.000000e+00> : vector<128xf32>
    %24 = vector.multi_reduction <add>, %23, %cst_16 [0] : vector<16x128xf32> to vector<128xf32>
    %25 = vector.shape_cast %24 : vector<128xf32> to vector<1x128xf32>
    %cst_17 = arith.constant 1.600000e+01 : f32
    %26 = vector.broadcast %cst_17 : f32 to vector<1x128xf32>
    %27 = arith.divf %25, %26 : vector<1x128xf32>
    %c0_18 = arith.constant 0 : index
    %c0_19 = arith.constant 0 : index
    %c0_20 = arith.constant 0 : index
    %28 = vector.load %arg4[%c0_18, %c0_19, %c0_20] : memref<3x2x128xf32, #tpu.memory_space<vmem>>, vector<1x1x128xf32>
    %29 = vector.shape_cast %28 : vector<1x1x128xf32> to vector<1x128xf32>
    %c0_21 = arith.constant 0 : index
    %c1 = arith.constant 1 : index
    %c0_22 = arith.constant 0 : index
    %30 = vector.load %arg4[%c0_21, %c1, %c0_22] : memref<3x2x128xf32, #tpu.memory_space<vmem>>, vector<1x1x128xf32>
    %31 = vector.shape_cast %30 : vector<1x1x128xf32> to vector<1x128xf32>
    %cst_23 = arith.constant 9.99999974E-6 : f32
    %32 = vector.broadcast %cst_23 : f32 to vector<1x128xf32>
    %33 = arith.addf %27, %32 : vector<1x128xf32>
    %34 = math.rsqrt %33 : vector<1x128xf32>
    %35 = arith.mulf %29, %34 : vector<1x128xf32>
    %36 = arith.mulf %20, %35 : vector<1x128xf32>
    %37 = arith.subf %31, %36 : vector<1x128xf32>
    %38 = vector.broadcast %35 : vector<1x128xf32> to vector<16x128xf32>
    %39 = arith.mulf %16, %38 : vector<16x128xf32>
    %40 = vector.broadcast %37 : vector<1x128xf32> to vector<16x128xf32>
    %41 = arith.addf %39, %40 : vector<16x128xf32>
    %cst_24 = arith.constant 5.000000e-01 : f32
    %42 = vector.broadcast %cst_24 : f32 to vector<16x128xf32>
    %43 = arith.mulf %42, %41 : vector<16x128xf32>
    %cst_25 = arith.constant 0.707106769 : f32
    %44 = vector.broadcast %cst_25 : f32 to vector<16x128xf32>
    %45 = arith.mulf %41, %44 : vector<16x128xf32>
    %46 = math.erf %45 : vector<16x128xf32>
    %cst_26 = arith.constant 1.000000e+00 : f32
    %47 = vector.broadcast %cst_26 : f32 to vector<16x128xf32>
    %48 = arith.addf %47, %46 : vector<16x128xf32>
    %49 = arith.mulf %43, %48 : vector<16x128xf32>
    %c1_i32_27 = arith.constant 1 : i32
    %c1_i32_28 = arith.constant 1 : i32
    %c0_i32_29 = arith.constant 0 : i32
    %c0_i32_30 = arith.constant 0 : i32
    %50 = tpu.memref_slice %arg6[%c1_i32_27, %c0_i32_29, %c0_i32_30] : memref<2x128x128xbf16, #tpu.memory_space<vmem>> -> memref<1x128x128xbf16, #tpu.memory_space<vmem>>
    %51 = tpu.memref_squeeze %50 : memref<1x128x128xbf16, #tpu.memory_space<vmem>> -> memref<128x128xbf16, #tpu.memory_space<vmem>>
    %52 = tpu.memref_slice %arg7[%c1_i32_28] : memref<2x!tpu.dma_semaphore, #tpu.memory_space<semaphore_mem>> -> memref<1x!tpu.dma_semaphore, #tpu.memory_space<semaphore_mem>>
    %53 = tpu.memref_squeeze %52 : memref<1x!tpu.dma_semaphore, #tpu.memory_space<semaphore_mem>> -> memref<!tpu.dma_semaphore, #tpu.memory_space<semaphore_mem>>
    tpu.wait_dma2 semaphore(%53 : memref<!tpu.dma_semaphore, #tpu.memory_space<semaphore_mem>>) src(%arg2 : memref<128x128xbf16, #tpu.memory_space<any>>) dst(%51 : memref<128x128xbf16, #tpu.memory_space<vmem>>)
    %c0_i32_31 = arith.constant 0 : i32
    %c0_i32_32 = arith.constant 0 : i32
    %c0_i32_33 = arith.constant 0 : i32
    %c0_i32_34 = arith.constant 0 : i32
    %54 = tpu.memref_slice %arg6[%c0_i32_31, %c0_i32_33, %c0_i32_34] : memref<2x128x128xbf16, #tpu.memory_space<vmem>> -> memref<1x128x128xbf16, #tpu.memory_space<vmem>>
    %55 = tpu.memref_squeeze %54 : memref<1x128x128xbf16, #tpu.memory_space<vmem>> -> memref<128x128xbf16, #tpu.memory_space<vmem>>
    %56 = tpu.memref_slice %arg7[%c0_i32_32] : memref<2x!tpu.dma_semaphore, #tpu.memory_space<semaphore_mem>> -> memref<1x!tpu.dma_semaphore, #tpu.memory_space<semaphore_mem>>
    %57 = tpu.memref_squeeze %56 : memref<1x!tpu.dma_semaphore, #tpu.memory_space<semaphore_mem>> -> memref<!tpu.dma_semaphore, #tpu.memory_space<semaphore_mem>>
    tpu.enqueue_dma source(%arg3 : memref<128x128xbf16, #tpu.memory_space<any>>) target(%55 : memref<128x128xbf16, #tpu.memory_space<vmem>>) target_semaphore(%57 : memref<!tpu.dma_semaphore, #tpu.memory_space<semaphore_mem>>)
    %c1_35 = arith.constant 1 : index
    %c0_36 = arith.constant 0 : index
    %c0_37 = arith.constant 0 : index
    %58 = vector.load %arg6[%c1_35, %c0_36, %c0_37] : memref<2x128x128xbf16, #tpu.memory_space<vmem>>, vector<1x128x128xbf16>
    %59 = vector.shape_cast %58 : vector<1x128x128xbf16> to vector<128x128xbf16>
    %60 = arith.truncf %49 : vector<16x128xf32> to vector<16x128xbf16>
    %cst_38 = arith.constant dense<0.000000e+00> : vector<16x128xf32>
    %61 = tpu.matmul %60, %59, %cst_38 {dimension_numbers = #tpu.dot_dimension_numbers<[1], [0], [0], [1], [0, 0, 1, 1], [], []>} : vector<16x128xbf16>, vector<128x128xbf16>, vector<16x128xf32> -> vector<16x128xf32>
    %cst_39 = arith.constant dense<0.000000e+00> : vector<128xf32>
    %62 = vector.multi_reduction <add>, %61, %cst_39 [0] : vector<16x128xf32> to vector<128xf32>
    %63 = vector.shape_cast %62 : vector<128xf32> to vector<1x128xf32>
    %cst_40 = arith.constant 1.600000e+01 : f32
    %64 = vector.broadcast %cst_40 : f32 to vector<1x128xf32>
    %65 = arith.divf %63, %64 : vector<1x128xf32>
    %66 = vector.broadcast %65 : vector<1x128xf32> to vector<16x128xf32>
    %67 = arith.subf %61, %66 : vector<16x128xf32>
    %68 = arith.mulf %67, %67 : vector<16x128xf32>
    %cst_41 = arith.constant dense<0.000000e+00> : vector<128xf32>
    %69 = vector.multi_reduction <add>, %68, %cst_41 [0] : vector<16x128xf32> to vector<128xf32>
    %70 = vector.shape_cast %69 : vector<128xf32> to vector<1x128xf32>
    %cst_42 = arith.constant 1.600000e+01 : f32
    %71 = vector.broadcast %cst_42 : f32 to vector<1x128xf32>
    %72 = arith.divf %70, %71 : vector<1x128xf32>
    %c1_43 = arith.constant 1 : index
    %c0_44 = arith.constant 0 : index
    %c0_45 = arith.constant 0 : index
    %73 = vector.load %arg4[%c1_43, %c0_44, %c0_45] : memref<3x2x128xf32, #tpu.memory_space<vmem>>, vector<1x1x128xf32>
    %74 = vector.shape_cast %73 : vector<1x1x128xf32> to vector<1x128xf32>
    %c1_46 = arith.constant 1 : index
    %c1_47 = arith.constant 1 : index
    %c0_48 = arith.constant 0 : index
    %75 = vector.load %arg4[%c1_46, %c1_47, %c0_48] : memref<3x2x128xf32, #tpu.memory_space<vmem>>, vector<1x1x128xf32>
    %76 = vector.shape_cast %75 : vector<1x1x128xf32> to vector<1x128xf32>
    %cst_49 = arith.constant 9.99999974E-6 : f32
    %77 = vector.broadcast %cst_49 : f32 to vector<1x128xf32>
    %78 = arith.addf %72, %77 : vector<1x128xf32>
    %79 = math.rsqrt %78 : vector<1x128xf32>
    %80 = arith.mulf %74, %79 : vector<1x128xf32>
    %81 = arith.mulf %65, %80 : vector<1x128xf32>
    %82 = arith.subf %76, %81 : vector<1x128xf32>
    %83 = vector.broadcast %80 : vector<1x128xf32> to vector<16x128xf32>
    %84 = arith.mulf %61, %83 : vector<16x128xf32>
    %85 = vector.broadcast %82 : vector<1x128xf32> to vector<16x128xf32>
    %86 = arith.addf %84, %85 : vector<16x128xf32>
    %cst_50 = arith.constant 5.000000e-01 : f32
    %87 = vector.broadcast %cst_50 : f32 to vector<16x128xf32>
    %88 = arith.mulf %87, %86 : vector<16x128xf32>
    %cst_51 = arith.constant 0.707106769 : f32
    %89 = vector.broadcast %cst_51 : f32 to vector<16x128xf32>
    %90 = arith.mulf %86, %89 : vector<16x128xf32>
    %91 = math.erf %90 : vector<16x128xf32>
    %cst_52 = arith.constant 1.000000e+00 : f32
    %92 = vector.broadcast %cst_52 : f32 to vector<16x128xf32>
    %93 = arith.addf %92, %91 : vector<16x128xf32>
    %94 = arith.mulf %88, %93 : vector<16x128xf32>
    %c0_i32_53 = arith.constant 0 : i32
    %c0_i32_54 = arith.constant 0 : i32
    %c0_i32_55 = arith.constant 0 : i32
    %c0_i32_56 = arith.constant 0 : i32
    %95 = tpu.memref_slice %arg6[%c0_i32_53, %c0_i32_55, %c0_i32_56] : memref<2x128x128xbf16, #tpu.memory_space<vmem>> -> memref<1x128x128xbf16, #tpu.memory_space<vmem>>
    %96 = tpu.memref_squeeze %95 : memref<1x128x128xbf16, #tpu.memory_space<vmem>> -> memref<128x128xbf16, #tpu.memory_space<vmem>>
    %97 = tpu.memref_slice %arg7[%c0_i32_54] : memref<2x!tpu.dma_semaphore, #tpu.memory_space<semaphore_mem>> -> memref<1x!tpu.dma_semaphore, #tpu.memory_space<semaphore_mem>>
    %98 = tpu.memref_squeeze %97 : memref<1x!tpu.dma_semaphore, #tpu.memory_space<semaphore_mem>> -> memref<!tpu.dma_semaphore, #tpu.memory_space<semaphore_mem>>
    tpu.wait_dma2 semaphore(%98 : memref<!tpu.dma_semaphore, #tpu.memory_space<semaphore_mem>>) src(%arg3 : memref<128x128xbf16, #tpu.memory_space<any>>) dst(%96 : memref<128x128xbf16, #tpu.memory_space<vmem>>)
    %c0_57 = arith.constant 0 : index
    %c0_58 = arith.constant 0 : index
    %c0_59 = arith.constant 0 : index
    %99 = vector.load %arg6[%c0_57, %c0_58, %c0_59] : memref<2x128x128xbf16, #tpu.memory_space<vmem>>, vector<1x128x128xbf16>
    %100 = vector.shape_cast %99 : vector<1x128x128xbf16> to vector<128x128xbf16>
    %101 = arith.truncf %94 : vector<16x128xf32> to vector<16x128xbf16>
    %cst_60 = arith.constant dense<0.000000e+00> : vector<16x128xf32>
    %102 = tpu.matmul %101, %100, %cst_60 {dimension_numbers = #tpu.dot_dimension_numbers<[1], [0], [0], [1], [0, 0, 1, 1], [], []>} : vector<16x128xbf16>, vector<128x128xbf16>, vector<16x128xf32> -> vector<16x128xf32>
    %cst_61 = arith.constant dense<0.000000e+00> : vector<128xf32>
    %103 = vector.multi_reduction <add>, %102, %cst_61 [0] : vector<16x128xf32> to vector<128xf32>
    %104 = vector.shape_cast %103 : vector<128xf32> to vector<1x128xf32>
    %cst_62 = arith.constant 1.600000e+01 : f32
    %105 = vector.broadcast %cst_62 : f32 to vector<1x128xf32>
    %106 = arith.divf %104, %105 : vector<1x128xf32>
    %107 = vector.broadcast %106 : vector<1x128xf32> to vector<16x128xf32>
    %108 = arith.subf %102, %107 : vector<16x128xf32>
    %109 = arith.mulf %108, %108 : vector<16x128xf32>
    %cst_63 = arith.constant dense<0.000000e+00> : vector<128xf32>
    %110 = vector.multi_reduction <add>, %109, %cst_63 [0] : vector<16x128xf32> to vector<128xf32>
    %111 = vector.shape_cast %110 : vector<128xf32> to vector<1x128xf32>
    %cst_64 = arith.constant 1.600000e+01 : f32
    %112 = vector.broadcast %cst_64 : f32 to vector<1x128xf32>
    %113 = arith.divf %111, %112 : vector<1x128xf32>
    %c2 = arith.constant 2 : index
    %c0_65 = arith.constant 0 : index
    %c0_66 = arith.constant 0 : index
    %114 = vector.load %arg4[%c2, %c0_65, %c0_66] : memref<3x2x128xf32, #tpu.memory_space<vmem>>, vector<1x1x128xf32>
    %115 = vector.shape_cast %114 : vector<1x1x128xf32> to vector<1x128xf32>
    %c2_67 = arith.constant 2 : index
    %c1_68 = arith.constant 1 : index
    %c0_69 = arith.constant 0 : index
    %116 = vector.load %arg4[%c2_67, %c1_68, %c0_69] : memref<3x2x128xf32, #tpu.memory_space<vmem>>, vector<1x1x128xf32>
    %117 = vector.shape_cast %116 : vector<1x1x128xf32> to vector<1x128xf32>
    %cst_70 = arith.constant 9.99999974E-6 : f32
    %118 = vector.broadcast %cst_70 : f32 to vector<1x128xf32>
    %119 = arith.addf %113, %118 : vector<1x128xf32>
    %120 = math.rsqrt %119 : vector<1x128xf32>
    %121 = arith.mulf %115, %120 : vector<1x128xf32>
    %122 = arith.mulf %106, %121 : vector<1x128xf32>
    %123 = arith.subf %117, %122 : vector<1x128xf32>
    %124 = vector.broadcast %121 : vector<1x128xf32> to vector<16x128xf32>
    %125 = arith.mulf %102, %124 : vector<16x128xf32>
    %126 = vector.broadcast %123 : vector<1x128xf32> to vector<16x128xf32>
    %127 = arith.addf %125, %126 : vector<16x128xf32>
    %cst_71 = arith.constant 5.000000e-01 : f32
    %128 = vector.broadcast %cst_71 : f32 to vector<16x128xf32>
    %129 = arith.mulf %128, %127 : vector<16x128xf32>
    %cst_72 = arith.constant 0.707106769 : f32
    %130 = vector.broadcast %cst_72 : f32 to vector<16x128xf32>
    %131 = arith.mulf %127, %130 : vector<16x128xf32>
    %132 = math.erf %131 : vector<16x128xf32>
    %cst_73 = arith.constant 1.000000e+00 : f32
    %133 = vector.broadcast %cst_73 : f32 to vector<16x128xf32>
    %134 = arith.addf %133, %132 : vector<16x128xf32>
    %135 = arith.mulf %129, %134 : vector<16x128xf32>
    %c0_74 = arith.constant 0 : index
    %c0_75 = arith.constant 0 : index
    %136 = vector.load %arg5[%c0_74, %c0_75] : memref<16x128xf32, #tpu.memory_space<vmem>>, vector<16x128xf32>
    tpu.vector_store %arg5[%c0_74, %c0_75], %135 {strides = array<i32>} : memref<16x128xf32, #tpu.memory_space<vmem>>, vector<16x128xf32>,
    return
  }
}

</mosaic_0001>

<bundles_post_ra>
// kernel: generator_forward.1
= control target key start
LH: loop header
LB: loop body
LE: loop exit
PB: predicated region body
PF: predicated region fallthrough
CT: control target
= control target key end

     0   :  { %10 = vsyncpa [#allocation5], 0  ;;  %s873_s0 = inlined_call_operand.vmem [shape: f32[16,32], index: 0, kind: input, shape index: {}]   ;;  %s874_s1 = inlined_call_operand.vmem [shape: bf16[32,128], index: 1, kind: input, shape index: {}]   ;;  %s875_s2 = inlined_call_operand.vmem [shape: bf16[128,128], index: 2, kind: input, shape index: {}]   ;;  %s876_s3 = inlined_call_operand.vmem [shape: bf16[128,128], index: 3, kind: input, shape index: {}]   ;;  %s877_s4 = inlined_call_operand.vmem [shape: f32[3,2,128], index: 4, kind: input, shape index: {}]   ;;  %s878_s5 = inlined_call_operand.hbm [shape: f32[16,128], index: 5, kind: output, shape index: {}]  }
   0x1   :  { %v48_v0 = vld [vmem:[%s874_s1] sm:$0xff]  ;;  %v50_v1 = vld [vmem:[%s874_s1 + $0x8] sm:$0xff] }
   0x2   :  { %59 = vsyncadd [#allocation3], 256  ;;  %v60_v2 = vld [vmem:[%s873_s0] sm:$0xff]  ;;  %v61_v3 = vld [vmem:[%s873_s0 + $0x8] sm:$0xff] }
   0x3   :  { %660 = dma.done.wait [#allocation3], 256 }
   0x4   :  { %661 = vsyncadd [#allocation3], 4294967040  ;;  %v718_v4 = vld [vmem:[%s875_s2] sm:$0xff]  ;;  %v723_v5 = vld [vmem:[%s875_s2 + $0x8] sm:$0xff] }
   0x5   :  { %v728_v6 = vld [vmem:[%s875_s2 + $0x10] sm:$0xff]  ;;  %v733_v7 = vld [vmem:[%s875_s2 + $0x18] sm:$0xff]  ;;  %v738_v8 = vld [vmem:[%s875_s2 + $0x20] sm:$0xff] }
   0x6   :  { %v743_v9 = vld [vmem:[%s875_s2 + $0x28] sm:$0xff]  ;;  %v748_v10 = vld [vmem:[%s875_s2 + $0x30] sm:$0xff]  ;;  %v753_v11 = vld [vmem:[%s875_s2 + $0x38] sm:$0xff] }
   0x7   :  { %123 = vsyncadd [#allocation3 + $0x1], 1024  ;;  %v668_v12 = vmov 0.0   ;;  %vm669_vm0 = vmmov 0   ;;  %v126_v13 = vpack.c.bf16 %v61_v3, %v60_v2  ;;  %vm127_vm1 = vcmask 261120  }
   0x8   :  { %567 = vmatprep.subr.bf16.mxu0 %v668_v12  ;;  %571 = vmatprep.mubr.msk.bf16.mxu0 %vm669_vm0, %v668_v12  ;;  %v200_v39 = vlaneseq  ;;  %v193_v41 = vld [vmem:[%s877_s4] sm:$0x1]  ;;  %v194_v45 = vld [vmem:[%s877_s4 + $0x1] sm:$0x1] }
   0x9   :  { %568 = vmatpush3.bf16.msra.mxu0 %v48_v0 }
   0xa   :  { %569 = vmatprep.subr.bf16.mxu0 %v668_v12  ;;  %v201_v40 = vshrl.u32 %v200_v39, 7 }
   0xc   :  { %v762_v42 = vsub.s32 0, %v201_v40 }
   0xd   :  { %570 = vmatpush3.bf16.msra.mxu0 %v50_v1 }
  0x10   :  { %572 = vmatmul.mubr.msk.bf16.vlgmr.msra.gmra.mrb[0].mxu0 %vm127_vm1, %v126_v13 }
  0xe3   :  { %v165_v14 = vpop.f32.mrb[0].mxu0 }
  0xe4   :  { %v573_v15 = vpop.f32.mrb[1].mxu0 }
  0xe5   :  { %v168_v16 = vpop.f32.mrb[2].mxu0 }
  0xe6   :  { %v172_v17 = vadd.f32 %v168_v16, %v165_v14  ;;  %v574_v18 = vpop.f32.mrb[3].mxu0 }
  0xe8   :  { %v173_v19 = vrot.slane %v172_v17, 4 }
  0xea   :  { %v174_v20 = vadd.f32 %v173_v19, %v172_v17 }
  0xec   :  { %v175_v21 = vrot.slane %v174_v20, 2 }
  0xee   :  { %v176_v22 = vadd.f32 %v175_v21, %v174_v20 }
  0xf0   :  { %v177_v23 = vrot.slane %v176_v22, 1 }
  0xf2   :  { %v178_v24 = vadd.f32 %v177_v23, %v176_v22 }
  0xf4   :  { %v180_v25 = vmul.f32 0.0625, %v178_v24 }
  0xf6   :  { %v181_v26 = vsub.f32 %v165_v14, %v180_v25  ;;  %v182_v27 = vsub.f32 %v168_v16, %v180_v25 }
  0xf8   :  { %v183_v28 = vmul.f32 %v181_v26, %v181_v26  ;;  %v184_v29 = vmul.f32 %v182_v27, %v182_v27 }
  0xfa   :  { %v185_v30 = vadd.f32 %v184_v29, %v183_v28 }
  0xfc   :  { %v186_v31 = vrot.slane %v185_v30, 4 }
  0xfe   :  { %v187_v32 = vadd.f32 %v186_v31, %v185_v30 }
 0x100   :  { %v188_v33 = vrot.slane %v187_v32, 2 }
 0x102   :  { %v189_v34 = vadd.f32 %v188_v33, %v187_v32 }
 0x104   :  { %v190_v35 = vrot.slane %v189_v34, 1 }
 0x106   :  { %v191_v36 = vadd.f32 %v190_v35, %v189_v34 }
 0x108   :  { %v192_v37 = vmul.f32 0.0625, %v191_v36 }
 0x10a   :  { %v195_v38 = vadd.f32 1e-05, %v192_v37 }
 0x10c   :  { %620 = vrsqrt.f32 %v195_v38 }
 0x116   :  { %v621_v43 = vpop.eup %620 }
 0x117   :  { %v197_v44 = vmul.f32 %v621_v43, %v193_v41 }
 0x119   :  { %v198_v46 = vmul.f32 %v197_v44, %v180_v25  ;;  %v203_v47 = vrot.slane %v197_v44, %v762_v42 }
 0x11b   :  { %v199_v48 = vsub.f32 %v194_v45, %v198_v46  ;;  %v204_v49 = vmul.f32 %v203_v47, %v165_v14  ;;  %v205_v50 = vmul.f32 %v203_v47, %v168_v16 }
 0x11d   :  { %v209_v51 = vrot.slane %v199_v48, %v762_v42 }
 0x11f   :  { %v210_v52 = vadd.f32 %v209_v51, %v204_v49  ;;  %v211_v53 = vadd.f32 %v209_v51, %v205_v50 }
 0x121   :  { %v214_v54 = vmul.f32 0.70710677, %v210_v52  ;;  %v215_v55 = vmul.f32 0.70710677, %v211_v53  ;;  %v212_v58 = vmul.f32 0.5, %v210_v52  ;;  %v213_v60 = vmul.f32 0.5, %v211_v53 }
 0x123   :  { %622 = verf.f32 %v214_v54 }
 0x124   :  { %624 = verf.f32 %v215_v55 }
 0x12d   :  { %v623_v56 = vpop.eup %622 }
 0x12e   :  { %v625_v57 = vpop.eup %624  ;;  %v218_v59 = vadd.f32 1.0, %v623_v56 }
 0x12f   :  { %v219_v61 = vadd.f32 1.0, %v625_v57 }
 0x130   :  { %v220_v62 = vmul.f32 %v218_v59, %v212_v58 }
 0x131   :  { %v221_v63 = vmul.f32 %v219_v61, %v213_v60 }
 0x132   :  { %662 = dma.done.wait [#allocation3 + $0x1], 1024 }
 0x133   :  { %663 = vsyncadd [#allocation3 + $0x1], 4294966272  ;;  %v772_v0 = vld [vmem:[%s876_s3] sm:$0xff]  ;;  %v777_v1 = vld [vmem:[%s876_s3 + $0x8] sm:$0xff] }
 0x134   :  { %v782_v2 = vld [vmem:[%s876_s3 + $0x10] sm:$0xff]  ;;  %v787_v3 = vld [vmem:[%s876_s3 + $0x18] sm:$0xff]  ;;  %v792_v13 = vld [vmem:[%s876_s3 + $0x20] sm:$0xff] }
 0x135   :  { %v797_v14 = vld [vmem:[%s876_s3 + $0x28] sm:$0xff]  ;;  %v802_v15 = vld [vmem:[%s876_s3 + $0x30] sm:$0xff]  ;;  %v807_v16 = vld [vmem:[%s876_s3 + $0x38] sm:$0xff] }
 0x136   :  { %281 = vsyncadd [#allocation3], 1024  ;;  %575 = vmatprep.subr.bf16.mxu1 %v668_v12  ;;  %591 = vmatprep.mubr.msk.bf16.mxu1 %vm669_vm0, %v668_v12  ;;  %v540_v35 = vld [vmem:[%s877_s4 + $0x2] sm:$0x1]  ;;  %v541_v38 = vld [vmem:[%s877_s4 + $0x3] sm:$0x1] }
 0x137   :  { %576 = vmatpush3.bf16.msra.mxu1 %v718_v4  ;;  %v290_v4 = vpack.c.bf16 %v221_v63, %v220_v62  ;;  %595 = vmatprep.subr.bf16.mxu0 %v668_v12 }
 0x138   :  { %577 = vmatprep.subr.bf16.mxu1 %v668_v12  ;;  %611 = vmatprep.mubr.msk.bf16.mxu0 %vm669_vm0, %v668_v12 }
 0x13b   :  { %578 = vmatpush3.bf16.msra.mxu1 %v723_v5 }
 0x13c   :  { %579 = vmatprep.subr.bf16.mxu1 %v668_v12 }
 0x13f   :  { %580 = vmatpush3.bf16.msra.mxu1 %v728_v6 }
 0x140   :  { %581 = vmatprep.subr.bf16.mxu1 %v668_v12 }
 0x143   :  { %582 = vmatpush3.bf16.msra.mxu1 %v733_v7 }
 0x144   :  { %583 = vmatprep.subr.bf16.mxu1 %v668_v12 }
 0x147   :  { %584 = vmatpush3.bf16.msra.mxu1 %v738_v8 }
 0x148   :  { %585 = vmatprep.subr.bf16.mxu1 %v668_v12 }
 0x14b   :  { %586 = vmatpush3.bf16.msra.mxu1 %v743_v9 }
 0x14c   :  { %587 = vmatprep.subr.bf16.mxu1 %v668_v12 }
 0x14f   :  { %588 = vmatpush3.bf16.msra.mxu1 %v748_v10 }
 0x150   :  { %589 = vmatprep.subr.bf16.mxu1 %v668_v12 }
 0x153   :  { %590 = vmatpush3.bf16.msra.mxu1 %v753_v11 }
 0x156   :  { %592 = vmatmul.mubr.bf16.vlgmr.msra.gmra.mrb[0].mxu1 %v290_v4 }
 0x229   :  { %v325_v5 = vpop.f32.mrb[0].mxu1 }
 0x22a   :  { %v593_v6 = vpop.f32.mrb[1].mxu1 }
 0x22b   :  { %v328_v7 = vpop.f32.mrb[2].mxu1 }
 0x22c   :  { %v332_v17 = vadd.f32 %v328_v7, %v325_v5  ;;  %v594_v18 = vpop.f32.mrb[3].mxu1 }
 0x22e   :  { %v333_v8 = vrot.slane %v332_v17, 4 }
 0x230   :  { %v334_v19 = vadd.f32 %v333_v8, %v332_v17 }
 0x232   :  { %v335_v20 = vrot.slane %v334_v19, 2 }
 0x234   :  { %v336_v21 = vadd.f32 %v335_v20, %v334_v19 }
 0x236   :  { %v337_v9 = vrot.slane %v336_v21, 1 }
 0x238   :  { %v338_v22 = vadd.f32 %v337_v9, %v336_v21 }
 0x23a   :  { %v339_v23 = vmul.f32 0.0625, %v338_v22 }
 0x23c   :  { %v340_v24 = vsub.f32 %v325_v5, %v339_v23  ;;  %v341_v10 = vsub.f32 %v328_v7, %v339_v23 }
 0x23e   :  { %v342_v25 = vmul.f32 %v340_v24, %v340_v24  ;;  %v343_v26 = vmul.f32 %v341_v10, %v341_v10 }
 0x240   :  { %v344_v27 = vadd.f32 %v343_v26, %v342_v25 }
 0x242   :  { %v345_v28 = vrot.slane %v344_v27, 4 }
 0x244   :  { %v346_v11 = vadd.f32 %v345_v28, %v344_v27 }
 0x246   :  { %v347_v29 = vrot.slane %v346_v11, 2 }
 0x248   :  { %v348_v30 = vadd.f32 %v347_v29, %v346_v11 }
 0x24a   :  { %v349_v31 = vrot.slane %v348_v30, 1 }
 0x24c   :  { %v350_v32 = vadd.f32 %v349_v31, %v348_v30 }
 0x24e   :  { %v351_v33 = vmul.f32 0.0625, %v350_v32 }
 0x250   :  { %v355_v34 = vadd.f32 1e-05, %v351_v33 }
 0x252   :  { %626 = vrsqrt.f32 %v355_v34 }
 0x25c   :  { %v627_v36 = vpop.eup %626 }
 0x25d   :  { %v357_v37 = vmul.f32 %v627_v36, %v540_v35 }
 0x25f   :  { %v358_v39 = vmul.f32 %v357_v37, %v339_v23  ;;  %v363_v40 = vrot.slane %v357_v37, %v762_v42 }
 0x261   :  { %v359_v41 = vsub.f32 %v541_v38, %v358_v39  ;;  %v364_v43 = vmul.f32 %v363_v40, %v325_v5  ;;  %v365_v44 = vmul.f32 %v363_v40, %v328_v7 }
 0x263   :  { %v369_v45 = vrot.slane %v359_v41, %v762_v42 }
 0x265   :  { %v370_v46 = vadd.f32 %v369_v45, %v364_v43  ;;  %v371_v47 = vadd.f32 %v369_v45, %v365_v44 }
 0x267   :  { %v374_v48 = vmul.f32 0.70710677, %v370_v46  ;;  %v375_v49 = vmul.f32 0.70710677, %v371_v47  ;;  %v372_v52 = vmul.f32 0.5, %v370_v46  ;;  %v373_v54 = vmul.f32 0.5, %v371_v47 }
 0x269   :  { %628 = verf.f32 %v374_v48 }
 0x26a   :  { %630 = verf.f32 %v375_v49 }
 0x273   :  { %v629_v50 = vpop.eup %628 }
 0x274   :  { %v631_v51 = vpop.eup %630  ;;  %v378_v53 = vadd.f32 1.0, %v629_v50 }
 0x275   :  { %v379_v55 = vadd.f32 1.0, %v631_v51 }
 0x276   :  { %v380_v56 = vmul.f32 %v378_v53, %v372_v52 }
 0x277   :  { %v381_v57 = vmul.f32 %v379_v55, %v373_v54 }
 0x278   :  { %664 = dma.done.wait [#allocation3], 1024 }
 0x279   :  { %665 = vsyncadd [#allocation3], 4294966272  ;;  %596 = vmatpush3.bf16.msra.mxu0 %v772_v0  ;;  %v392_v58 = vpack.c.bf16 %v381_v57, %v380_v56  ;;  %v542_v22 = vld [vmem:[%s877_s4 + $0x4] sm:$0x1]  ;;  %v543_v10 = vld [vmem:[%s877_s4 + $0x5] sm:$0x1] }
 0x27a   :  { %597 = vmatprep.subr.bf16.mxu0 %v668_v12  ;;  %s670_s14 = smov [#allocation4]  }
 0x27b   :  { %s491_s2 = sshll.u32 %s670_s14, 4  ;;  %s492_s2 = int_to_ptr.vmem [resolvable:$true] %s491_s2 }
 0x27c   :  { %s638_s4 = scalar_lea.vmem %s492_s2, 256  ;;  %p643_p1 = scmp.lt.s32.totalorder %s492_s2, %s492_s2 }
 0x27d   :  { %598 = vmatpush3.bf16.msra.mxu0 %v777_v1  ;;  %p639_p0 = scmp.ne.s32.totalorder %s492_s2, %s638_s4  ;;  %p644_p2 = scmp.lt.s32.totalorder %s638_s4, %s638_s4 }
 0x27e   :  { %599 = vmatprep.subr.bf16.mxu0 %v668_v12 }
 0x27f   :  { %p645_p3 = por %p644_p2, %p643_p1 }
 0x281   :  { %600 = vmatpush3.bf16.msra.mxu0 %v782_v2  ;;  %p646_p4 = pnand %p645_p3, %p639_p0 }
 0x282   :  { %601 = vmatprep.subr.bf16.mxu0 %v668_v12 }
 0x285   :  { %602 = vmatpush3.bf16.msra.mxu0 %v787_v3 }
 0x286   :  { %603 = vmatprep.subr.bf16.mxu0 %v668_v12 }
 0x289   :  { %604 = vmatpush3.bf16.msra.mxu0 %v792_v13 }
 0x28a   :  { %605 = vmatprep.subr.bf16.mxu0 %v668_v12 }
 0x28d   :  { %606 = vmatpush3.bf16.msra.mxu0 %v797_v14 }
 0x28e   :  { %607 = vmatprep.subr.bf16.mxu0 %v668_v12 }
 0x291   :  { %608 = vmatpush3.bf16.msra.mxu0 %v802_v15 }
 0x292   :  { %609 = vmatprep.subr.bf16.mxu0 %v668_v12 }
 0x295   :  { %610 = vmatpush3.bf16.msra.mxu0 %v807_v16 }
 0x298   :  { %612 = vmatmul.mubr.bf16.vlgmr.msra.gmra.mrb[4].mxu0 %v392_v58 }
 0x36b   :  { %v427_v59 = vpop.f32.mrb[4].mxu0 }
 0x36c   :  { %v613_v60 = vpop.f32.mrb[5].mxu0 }
 0x36d   :  { %v430_v61 = vpop.f32.mrb[6].mxu0 }
 0x36e   :  { %v434_v62 = vadd.f32 %v430_v61, %v427_v59  ;;  %v614_v63 = vpop.f32.mrb[7].mxu0 }
 0x370   :  { %v435_v0 = vrot.slane %v434_v62, 4 }
 0x372   :  { %v436_v1 = vadd.f32 %v435_v0, %v434_v62 }
 0x374   :  { %v437_v2 = vrot.slane %v436_v1, 2 }
 0x376   :  { %v438_v3 = vadd.f32 %v437_v2, %v436_v1 }
 0x378   :  { %v439_v13 = vrot.slane %v438_v3, 1 }
 0x37a   :  { %v440_v14 = vadd.f32 %v439_v13, %v438_v3 }
 0x37c   :  { %v441_v4 = vmul.f32 0.0625, %v440_v14 }
 0x37e   :  { %v442_v5 = vsub.f32 %v427_v59, %v441_v4  ;;  %v443_v15 = vsub.f32 %v430_v61, %v441_v4 }
 0x380   :  { %v444_v6 = vmul.f32 %v442_v5, %v442_v5  ;;  %v445_v12 = vmul.f32 %v443_v15, %v443_v15 }
 0x382   :  { %v446_v7 = vadd.f32 %v445_v12, %v444_v6 }
 0x384   :  { %v447_v17 = vrot.slane %v446_v7, 4 }
 0x386   :  { %v448_v16 = vadd.f32 %v447_v17, %v446_v7 }
 0x388   :  { %v449_v18 = vrot.slane %v448_v16, 2 }
 0x38a   :  { %v450_v8 = vadd.f32 %v449_v18, %v448_v16 }
 0x38c   :  { %v451_v19 = vrot.slane %v450_v8, 1 }
 0x38e   :  { %v452_v20 = vadd.f32 %v451_v19, %v450_v8 }
 0x390   :  { %v453_v21 = vmul.f32 0.0625, %v452_v20 }
 0x392   :  { %v457_v9 = vadd.f32 1e-05, %v453_v21 }
 0x394   :  { %632 = vrsqrt.f32 %v457_v9 }
 0x39e   :  { %v633_v23 = vpop.eup %632 }
 0x39f   :  { %v459_v24 = vmul.f32 %v633_v23, %v542_v22 }
 0x3a1   :  { %v460_v25 = vmul.f32 %v459_v24, %v441_v4  ;;  %v465_v26 = vrot.slane %v459_v24, %v762_v42 }
 0x3a3   :  { %v461_v27 = vsub.f32 %v543_v10, %v460_v25  ;;  %v466_v28 = vmul.f32 %v465_v26, %v427_v59  ;;  %v467_v11 = vmul.f32 %v465_v26, %v430_v61 }
 0x3a5   :  { %v471_v29 = vrot.slane %v461_v27, %v762_v42 }
 0x3a7   :  { %v472_v30 = vadd.f32 %v471_v29, %v466_v28  ;;  %v473_v31 = vadd.f32 %v471_v29, %v467_v11 }
 0x3a9   :  { %v476_v32 = vmul.f32 0.70710677, %v472_v30  ;;  %v477_v33 = vmul.f32 0.70710677, %v473_v31  ;;  %v474_v36 = vmul.f32 0.5, %v472_v30  ;;  %v475_v38 = vmul.f32 0.5, %v473_v31 }
 0x3ab   :  { %634 = verf.f32 %v476_v32 }
 0x3ac   :  { %636 = verf.f32 %v477_v33 }
 0x3b5   :  { %v635_v34 = vpop.eup %634 }
 0x3b6   :  { %v637_v35 = vpop.eup %636  ;;  %v480_v37 = vadd.f32 1.0, %v635_v34 }
 0x3b7   :  { %v481_v39 = vadd.f32 1.0, %v637_v35 }
 0x3b8   :  { %v482_v40 = vmul.f32 %v480_v37, %v474_v36 }
 0x3b9   :  { %v483_v41 = vmul.f32 %v481_v39, %v475_v38 }
 0x3ba   :  { %484 = vst [vmem:[#allocation4] sm:$0xff] %v482_v40 }
 0x3bb   :  { %485 = vst [vmem:[#allocation4 + $0x8] sm:$0xff] %v483_v41 }
 0x3bc   :  { %649 = shalt.err (!%p646_p4)
}
 0x3bd   :  { %s650_s17 = scalar_lea.hbm %s878_s5, 256 }
 0x3be   :  { %p651_p5 = scmp.ne.s32.totalorder %s878_s5, %s650_s17  ;;  %p654_p6 = scmp.lt.u32.totalorder %s650_s17, %s878_s5 }
 0x3c0   :  { %p656_p7 = pnand %p654_p6, %p651_p5 }
 0x3c2   :  { %659 = shalt.err (!%p656_p7)
}
 0x3c3   :  { %s671_s22 = smov 128   ;;  %s672_s23 = smov 8  }
 0x3c4   :  { %497 = dma.vmem_to_hbm [thread:$0]  %s492_s2, 256, %s878_s5, [#allocation5], %s671_s22, %s671_s22, %s672_s23  }
 0x3c5   :  { %666 = dma.done.wait [#allocation5], 256  }
 0x3c6   :  { %667 = vsyncadd [#allocation5], 4294967040 }
 0x3c7   :  { %501 = vsyncpa [#allocation5], 1 }
 0x3c8   :  { %502 = vsyncmov [#allocation3] }
 0x3cb   :  { %s503_s26 = vpop.sfrf %502 }
 0x3cc   :  { %p544_p8 = scmp.ne.s32.totalorder %s503_s26, 0 }
 0x3ce   :  { %507 = shalt.err (%p544_p8)  }
 0x3cf   :  { %509 = vsyncmov [#allocation3 + $0x1] }
 0x3d2   :  { %s510_s27 = vpop.sfrf %509 }
 0x3d3   :  { %p545_p9 = scmp.ne.s32.totalorder %s510_s27, 0 }
 0x3d5   :  { %514 = shalt.err (%p545_p9)  }

</bundles_post_ra>
